<compile_context>
chip_gen: v5e
topology: v5e:2x2
jax: 0.10.0
libtpu: 0.0.40
codegen_flags: <defaults>
</compile_context>

<pallas_src>
import functools

import jax
import jax.numpy as jnp
from jax.experimental import pallas as pl
from jax.experimental.pallas import tpu as pltpu


_STATS_REPL = 8  # rows of the all-ones LHS used for the MXU column-sum trick


@functools.lru_cache(maxsize=None)
def _budgets():
    """Generation-aware sizing: tile bytes, fused-path limit, VMEM limit."""
    try:
        vmem = pltpu.get_tpu_info().vmem_capacity_bytes
    except Exception:  # unknown / emulated target -> assume smallest (v7x)
        vmem = 64 << 20
    if vmem >= (96 << 20):       # v5e / v6e: 128 MiB physical VMEM
        return {"tile_bytes": 4 << 20, "fused_limit": 8 << 20,
                "vmem_limit": 80 << 20}
    else:                        # v7x: 64 MiB physical VMEM, ~3.2 TB/s HBM
        return {"tile_bytes": 6 << 20, "fused_limit": 4 << 20,
                "vmem_limit": 48 << 20}


# --------------------------- fused path (small inputs) ------------------------

def _bn_fused_kernel(x_ref, gamma_ref, beta_ref, o_ref, *, eps, inv_m, p, c):
    # Whole (packed) array as one block; numerically stable centered variance.
    x = x_ref[...].astype(jnp.float32)                       # (Mp, cp)
    s = jnp.sum(x, axis=0, keepdims=True)                    # per packed column
    tot_s = s
    for j in range(1, p):                                    # fold the p packed
        tot_s = tot_s + pltpu.roll(s, shift=j * c, axis=1)   # copies per channel
    mean = tot_s * inv_m                                      # (1, cp)
    d = x - mean
    q = jnp.sum(d * d, axis=0, keepdims=True)
    tot_q = q
    for j in range(1, p):
        tot_q = tot_q + pltpu.roll(q, shift=j * c, axis=1)
    var = tot_q * inv_m                                       # biased variance
    scale = gamma_ref[...] * jax.lax.rsqrt(var + eps)
    shift = beta_ref[...] - mean * scale
    o_ref[...] = (x * scale + shift).astype(o_ref.dtype)


def _bn_fused(x2p, gamma_p, beta_p, eps, m_true, c, p, vmem_limit):
    m_packed, cp = x2p.shape
    return pl.pallas_call(
        functools.partial(_bn_fused_kernel, eps=eps, inv_m=1.0 / m_true,
                          p=p, c=c),
        out_shape=jax.ShapeDtypeStruct((m_packed, cp), x2p.dtype),
        grid=(1,),
        in_specs=[
            pl.BlockSpec((m_packed, cp), lambda i: (0, 0)),
            pl.BlockSpec((1, cp), lambda i: (0, 0)),
            pl.BlockSpec((1, cp), lambda i: (0, 0)),
        ],
        out_specs=pl.BlockSpec((m_packed, cp), lambda i: (0, 0)),
        compiler_params=pltpu.CompilerParams(
            dimension_semantics=("arbitrary",),
            vmem_limit_bytes=vmem_limit),
    )(x2p, gamma_p, beta_p)


# --------------------------- tiled two-pass path ------------------------------

def _bn_stats_kernel(x_ref, sum_ref, ssq_ref, *, tm, n_inner, m_valid):
    i = pl.program_id(0)           # "parallel" slice (megacore shard on v7x)
    j = pl.program_id(1)           # "arbitrary" reduction over row tiles

    @pl.when(j == 0)
    def _init():
        sum_ref[...] = jnp.zeros_like(sum_ref)
        ssq_ref[...] = jnp.zeros_like(ssq_ref)

    # Mask rows past the true row count: the ragged last tile (and any clamped
    # duplicate tile) reads garbage, not zeros.
    start = (i * n_inner + j) * tm
    row = jax.lax.broadcasted_iota(jnp.int32, (tm, 1), 0) + start
    x = jnp.where(row < m_valid, x_ref[...].astype(jnp.float32), 0.0)

    # Column sums on the (otherwise idle) MXU.  Every one of the _STATS_REPL
    # result rows is an identical full column sum; pass 2 divides by
    # _STATS_REPL when folding the sublanes.
    ones = jnp.ones((_STATS_REPL, tm), jnp.float32)
    sum_ref[...] += jnp.dot(ones, x, preferred_element_type=jnp.float32)
    ssq_ref[...] += jnp.dot(ones, x * x, preferred_element_type=jnp.float32)


def _bn_norm_kernel(x_ref, sum_ref, ssq_ref, gamma_ref, beta_ref, o_ref,
                    *, p, c, inv_m, eps):
    # Fold the partial sums: sublane fold over (n_outer * _STATS_REPL) rows
    # (each row is a full copy -> divide by _STATS_REPL), then lane fold over
    # the p packed channel copies via cyclic rolls.  One vreg of work per tile.
    tot_s = jnp.sum(sum_ref[...], axis=0, keepdims=True) * (1.0 / _STATS_REPL)
    tot_q = jnp.sum(ssq_ref[...], axis=0, keepdims=True) * (1.0 / _STATS_REPL)
    s, q = tot_s, tot_q
    for j in range(1, p):
        s = s + pltpu.roll(tot_s, shift=j * c, axis=1)
        q = q + pltpu.roll(tot_q, shift=j * c, axis=1)
    mean = s * inv_m
    var = jnp.maximum(q * inv_m - mean * mean, 0.0)           # biased variance
    scale = gamma_ref[...] * jax.lax.rsqrt(var + eps)
    shift = beta_ref[...] - mean * scale
    o_ref[...] = (x_ref[...].astype(jnp.float32) * scale
                  + shift).astype(o_ref.dtype)


def _bn_tiled(x2p, gamma_p, beta_p, eps, m_true, c, p, tile_bytes, vmem_limit):
    m_packed, cp = x2p.shape
    tm = max(8, min((tile_bytes // (cp * 4)) // 8 * 8, 32768))
    n_tiles = pl.cdiv(m_packed, tm)
    n_outer = 2 if n_tiles >= 2 else 1   # stats-pass shards (both TCs on v7x)
    n_inner = pl.cdiv(n_tiles, n_outer)
    rows = n_outer * _STATS_REPL

    # Pass 1: per-(packed-)column sum / sum-of-squares partials.
    sums, ssqs = pl.pallas_call(
        functools.partial(_bn_stats_kernel, tm=tm, n_inner=n_inner,
                          m_valid=m_packed),
        out_shape=(jax.ShapeDtypeStruct((rows, cp), jnp.float32),
                   jax.ShapeDtypeStruct((rows, cp), jnp.float32)),
        grid=(n_outer, n_inner),
        in_specs=[pl.BlockSpec(
            (tm, cp),
            lambda i, j: (jnp.minimum(i * n_inner + j, n_tiles - 1), 0))],
        out_specs=(pl.BlockSpec((_STATS_REPL, cp), lambda i, j: (i, 0)),
                   pl.BlockSpec((_STATS_REPL, cp), lambda i, j: (i, 0))),
        compiler_params=pltpu.CompilerParams(
            dimension_semantics=("parallel", "arbitrary"),
            vmem_limit_bytes=vmem_limit),
    )(x2p)

    # Pass 2: streaming normalize; scale/shift derived in-kernel per tile
    # (no intervening XLA finalize).  Exact unpadded out_shape: the partial
    # last block is handled by Pallas' masked writeback.
    # TODO(synk): add input_output_aliases={0: 0} when callers donate x.
    return pl.pallas_call(
        functools.partial(_bn_norm_kernel, p=p, c=c, inv_m=1.0 / m_true,
                          eps=eps),
        out_shape=jax.ShapeDtypeStruct((m_packed, cp), x2p.dtype),
        grid=(n_tiles,),
        in_specs=[
            pl.BlockSpec((tm, cp), lambda i: (i, 0)),
            pl.BlockSpec((rows, cp), lambda i: (0, 0)),
            pl.BlockSpec((rows, cp), lambda i: (0, 0)),
            pl.BlockSpec((1, cp), lambda i: (0, 0)),
            pl.BlockSpec((1, cp), lambda i: (0, 0)),
        ],
        out_specs=pl.BlockSpec((tm, cp), lambda i: (i, 0)),
        compiler_params=pltpu.CompilerParams(
            dimension_semantics=("parallel",),
            vmem_limit_bytes=vmem_limit),
    )(x2p, sums, ssqs, gamma_p, beta_p)


# --------------------------------- wrapper ------------------------------------

@functools.partial(jax.jit, static_argnames=("eps",))
def batchnorm1d_ex(x, gamma, beta, eps=1e-5):
    """Forward of BatchNorm1dEx (training-mode batch statistics)."""
    if x.ndim == 2:
        m_true, c = x.shape
        x2 = x
    elif x.ndim == 3:
        n, l, c = x.shape
        m_true = n * l
        x2 = x.reshape(m_true, c)
    else:
        raise ValueError(
            f"Invalid input size, expected (N, C) or (N, L, C), but got {x.shape}")

    # Lane packing: view (M, C) as (M/P, P*C) (128-lane-dense tiles, unmasked
    # stores) -- only when it is a free row-major metadata reshape.
    p = 128 // c if (c < 128 and 128 % c == 0 and m_true % (128 // c) == 0) else 1
    cp = p * c
    x2p = x2.reshape(m_true // p, cp)

    gamma_p = jnp.tile(gamma.astype(jnp.float32).reshape(1, c), (1, p))
    beta_p = jnp.tile(beta.astype(jnp.float32).reshape(1, c), (1, p))

    b = _budgets()
    if m_true * c * 4 <= b["fused_limit"]:
        out_p = _bn_fused(x2p, gamma_p, beta_p, eps, m_true, c, p,
                          b["vmem_limit"])
    else:
        out_p = _bn_tiled(x2p, gamma_p, beta_p, eps, m_true, c, p,
                          b["tile_bytes"], b["vmem_limit"])
    return out_p.reshape(x.shape)


# -------------------------------- reference -----------------------------------

def _reference(x, gamma, beta, eps=1e-5):
    """Pure-JAX reference mirroring torch.nn.BatchNorm1d training forward."""
    if x.ndim == 2:
        red = (0,)
        g = gamma.reshape(1, -1)
        b = beta.reshape(1, -1)
    else:  # (N, L, C) -> stats over N and L
        red = (0, 1)
        g = gamma.reshape(1, 1, -1)
        b = beta.reshape(1, 1, -1)
    xf = x.astype(jnp.float32)
    mean = jnp.mean(xf, axis=red, keepdims=True)
    var = jnp.mean((xf - mean) ** 2, axis=red, keepdims=True)  # biased
    return (g * (xf - mean) / jnp.sqrt(var + eps) + b).astype(x.dtype)


if __name__ == "__main__":
    keys = jax.random.split(jax.random.PRNGKey(0), 10)

    def check(x, gamma, beta, name, tol):
        y = batchnorm1d_ex(x, gamma, beta)
        jax.block_until_ready(y)
        ref = _reference(x, gamma, beta)
        assert y.shape == x.shape and y.dtype == x.dtype, name
        assert jnp.allclose(y, ref, atol=tol, rtol=tol), name

    c32 = 32
    gamma32 = 1.0 + 0.1 * jax.random.normal(keys[0], (c32,), jnp.float32)
    beta32 = 0.1 * jax.random.normal(keys[1], (c32,), jnp.float32)

    # Fused single-block, lane-packed paths (small shapes).
    check(jax.random.normal(keys[2], (2, 8, c32), jnp.float32), gamma32, beta32,
          "3D small (fused, packed)", 1e-5)
    check(jax.random.normal(keys[3], (4, c32), jnp.float32), gamma32, beta32,
          "2D small (fused, packed)", 1e-5)
    # Fused, unpacked (row count not a multiple of 128 // C).
    check(jax.random.normal(keys[4], (5, 101, c32), jnp.float32), gamma32, beta32,
          "3D odd rows (fused, unpacked)", 1e-5)
    # Tiled two-pass, lane-packed, ragged last tile + clamped stats tile.
    check(jax.random.normal(keys[5], (150, 500, c32), jnp.float32), gamma32, beta32,
          "3D medium (tiled, packed)", 1e-3)
    # Tiled two-pass with C that does not divide 128 (unpacked path).
    c48 = 48
    gamma48 = 1.0 + 0.1 * jax.random.normal(keys[6], (c48,), jnp.float32)
    beta48 = 0.1 * jax.random.normal(keys[7], (c48,), jnp.float32)
    check(jax.random.normal(keys[8], (300, 200, c48), jnp.float32), gamma48, beta48,
          "3D medium (tiled, unpacked C=48)", 1e-3)

    print("KERNEL_OK")
</pallas_src>

<mosaic_0001>
module attributes {stable_mosaic.version = 11 : i64} {
  func.func @_bn_fused_kernel(%arg0: i32, %arg1: memref<4x128xf32, #tpu.memory_space<vmem>>, %arg2: memref<1x128xf32, #tpu.memory_space<vmem>>, %arg3: memref<1x128xf32, #tpu.memory_space<vmem>>, %arg4: memref<4x128xf32, #tpu.memory_space<vmem>>) attributes {dimension_semantics = [#tpu.dimension_semantics<arbitrary>], iteration_bounds = array<i64: 1>, scalar_prefetch = 0 : i64, scratch_operands = 0 : i64, tpu.core_type = #tpu.core_type<tc>, window_params = [{pipeline_mode = #tpu.pipeline_mode<synchronous>, transform_indices = @transform_0, window_bounds = array<i64: 4, 128>}, {pipeline_mode = #tpu.pipeline_mode<synchronous>, transform_indices = @transform_1, window_bounds = array<i64: 1, 128>}, {pipeline_mode = #tpu.pipeline_mode<synchronous>, transform_indices = @transform_2, window_bounds = array<i64: 1, 128>}, {pipeline_mode = #tpu.pipeline_mode<synchronous>, transform_indices = @transform_3, window_bounds = array<i64: 4, 128>}]} {
    %c0 = arith.constant 0 : index
    %c0_0 = arith.constant 0 : index
    %0 = vector.load %arg1[%c0, %c0_0] : memref<4x128xf32, #tpu.memory_space<vmem>>, vector<4x128xf32>
    %cst = arith.constant dense<0.000000e+00> : vector<128xf32>
    %1 = vector.multi_reduction <add>, %0, %cst [0] : vector<4x128xf32> to vector<128xf32>
    %2 = vector.shape_cast %1 : vector<128xf32> to vector<1x128xf32>
    %c32_i32 = arith.constant 32 : i32
    %3 = tpu.dynamic_rotate %2 by %c32_i32 dim 1 : vector<1x128xf32>, i32 -> vector<1x128xf32>
    %4 = arith.addf %2, %3 : vector<1x128xf32>
    %c64_i32 = arith.constant 64 : i32
    %5 = tpu.dynamic_rotate %2 by %c64_i32 dim 1 : vector<1x128xf32>, i32 -> vector<1x128xf32>
    %6 = arith.addf %4, %5 : vector<1x128xf32>
    %c96_i32 = arith.constant 96 : i32
    %7 = tpu.dynamic_rotate %2 by %c96_i32 dim 1 : vector<1x128xf32>, i32 -> vector<1x128xf32>
    %8 = arith.addf %6, %7 : vector<1x128xf32>
    %cst_1 = arith.constant 6.250000e-02 : f32
    %9 = vector.broadcast %cst_1 : f32 to vector<1x128xf32>
    %10 = arith.mulf %8, %9 : vector<1x128xf32>
    %11 = vector.broadcast %10 : vector<1x128xf32> to vector<4x128xf32>
    %12 = arith.subf %0, %11 : vector<4x128xf32>
    %13 = arith.mulf %12, %12 : vector<4x128xf32>
    %cst_2 = arith.constant dense<0.000000e+00> : vector<128xf32>
    %14 = vector.multi_reduction <add>, %13, %cst_2 [0] : vector<4x128xf32> to vector<128xf32>
    %15 = vector.shape_cast %14 : vector<128xf32> to vector<1x128xf32>
    %c32_i32_3 = arith.constant 32 : i32
    %16 = tpu.dynamic_rotate %15 by %c32_i32_3 dim 1 : vector<1x128xf32>, i32 -> vector<1x128xf32>
    %17 = arith.addf %15, %16 : vector<1x128xf32>
    %c64_i32_4 = arith.constant 64 : i32
    %18 = tpu.dynamic_rotate %15 by %c64_i32_4 dim 1 : vector<1x128xf32>, i32 -> vector<1x128xf32>
    %19 = arith.addf %17, %18 : vector<1x128xf32>
    %c96_i32_5 = arith.constant 96 : i32
    %20 = tpu.dynamic_rotate %15 by %c96_i32_5 dim 1 : vector<1x128xf32>, i32 -> vector<1x128xf32>
    %21 = arith.addf %19, %20 : vector<1x128xf32>
    %cst_6 = arith.constant 6.250000e-02 : f32
    %22 = vector.broadcast %cst_6 : f32 to vector<1x128xf32>
    %23 = arith.mulf %21, %22 : vector<1x128xf32>
    %c0_7 = arith.constant 0 : index
    %c0_8 = arith.constant 0 : index
    %24 = vector.load %arg2[%c0_7, %c0_8] : memref<1x128xf32, #tpu.memory_space<vmem>>, vector<1x128xf32>
    %cst_9 = arith.constant 9.99999974E-6 : f32
    %25 = vector.broadcast %cst_9 : f32 to vector<1x128xf32>
    %26 = arith.addf %23, %25 : vector<1x128xf32>
    %27 = math.rsqrt %26 : vector<1x128xf32>
    %28 = arith.mulf %24, %27 : vector<1x128xf32>
    %c0_10 = arith.constant 0 : index
    %c0_11 = arith.constant 0 : index
    %29 = vector.load %arg3[%c0_10, %c0_11] : memref<1x128xf32, #tpu.memory_space<vmem>>, vector<1x128xf32>
    %30 = arith.mulf %10, %28 : vector<1x128xf32>
    %31 = arith.subf %29, %30 : vector<1x128xf32>
    %32 = vector.broadcast %28 : vector<1x128xf32> to vector<4x128xf32>
    %33 = arith.mulf %0, %32 : vector<4x128xf32>
    %34 = vector.broadcast %31 : vector<1x128xf32> to vector<4x128xf32>
    %35 = arith.addf %33, %34 : vector<4x128xf32>
    %c0_12 = arith.constant 0 : index
    %c0_13 = arith.constant 0 : index
    %36 = vector.load %arg4[%c0_12, %c0_13] : memref<4x128xf32, #tpu.memory_space<vmem>>, vector<4x128xf32>
    tpu.vector_store %arg4[%c0_12, %c0_13], %35 {strides = array<i32>} : memref<4x128xf32, #tpu.memory_space<vmem>>, vector<4x128xf32>,
    return
  }
  func.func @transform_0(%arg0: i32) -> (i32, i32) {
    %c0_i32 = arith.constant 0 : i32
    %c0_i32_0 = arith.constant 0 : i32
    %c0_i32_1 = arith.constant 0 : i32
    return %c0_i32, %c0_i32_0 : i32, i32
  }
  func.func @transform_1(%arg0: i32) -> (i32, i32) {
    %c0_i32 = arith.constant 0 : i32
    %c0_i32_0 = arith.constant 0 : i32
    %c0_i32_1 = arith.constant 0 : i32
    return %c0_i32, %c0_i32_0 : i32, i32
  }
  func.func @transform_2(%arg0: i32) -> (i32, i32) {
    %c0_i32 = arith.constant 0 : i32
    %c0_i32_0 = arith.constant 0 : i32
    %c0_i32_1 = arith.constant 0 : i32
    return %c0_i32, %c0_i32_0 : i32, i32
  }
  func.func @transform_3(%arg0: i32) -> (i32, i32) {
    %c0_i32 = arith.constant 0 : i32
    %c0_i32_0 = arith.constant 0 : i32
    %c0_i32_1 = arith.constant 0 : i32
    return %c0_i32, %c0_i32_0 : i32, i32
  }
}

</mosaic_0001>

<bundles_post_ra>
// kernel: batchnorm1d_ex.1
= control target key start
LH: loop header
LB: loop body
LE: loop exit
PB: predicated region body
PF: predicated region fallthrough
CT: control target
= control target key end

     0   :  { %vm15_vm0 = vcmask 1043456   ;;  %s87_s14 = smov 32   ;;  %s88_s15 = smov 96   ;;  %s124_s0 = inlined_call_operand.vmem [shape: f32[4,128], index: 0, kind: input, shape index: {}]   ;;  %s125_s1 = inlined_call_operand.vmem [shape: f32[1,128], index: 1, kind: input, shape index: {}]   ;;  %s126_s2 = inlined_call_operand.vmem [shape: f32[1,128], index: 2, kind: input, shape index: {}]   ;;  %s127_s3 = inlined_call_operand.vmem [shape: f32[4,128], index: 3, kind: output, shape index: {}]  }
   0x1   :  { %v14_v0 = vld [vmem:[%s124_s0] sm:$0xf]  ;;  %s89_s16 = smov 64  }
   0x2   :  { %v16_v1 = vsel %vm15_vm0, %v14_v0, 0.0  ;;  %v53_v38 = vld [vmem:[%s125_s1] sm:$0x1] }
   0x3   :  { %v17_v2 = vrot.slane %v16_v1, 4  ;;  %v66_v42 = vld [vmem:[%s126_s2] sm:$0x1] }
   0x5   :  { %v18_v3 = vadd.f32 %v17_v2, %v16_v1 }
   0x7   :  { %v19_v4 = vrot.slane %v18_v3, 2 }
   0x9   :  { %v20_v5 = vadd.f32 %v19_v4, %v18_v3 }
   0xb   :  { %v21_v6 = vrot.slane %v20_v5, 1 }
   0xd   :  { %v22_v7 = vadd.f32 %v21_v6, %v20_v5 }
   0xf   :  { %23 = vrot.lane.b32.xlu0 %v22_v7, %s87_s14  ;;  %29 = vrot.lane.b32.xlu1 %v22_v7, %s88_s15 }
  0x17   :  { %26 = vrot.lane.b32.xlu0 %v22_v7, %s89_s16 }
  0x81   :  { %v24_v8 = vpop.permute.xlu0 %23  ;;  %v30_v11 = vpop.permute.xlu1 %29 }
  0x82   :  { %v25_v9 = vadd.f32 %v24_v8, %v22_v7 }
  0x89   :  { %v27_v10 = vpop.permute.xlu0 %26 }
  0x8a   :  { %v28_v12 = vadd.f32 %v27_v10, %v25_v9 }
  0x8c   :  { %v31_v13 = vadd.f32 %v30_v11, %v28_v12 }
  0x8e   :  { %v32_v14 = vmul.f32 0.0625, %v31_v13 }
  0x90   :  { %v33_v15 = vperm.slane %v32_v14, 0 }
  0x92   :  { %v34_v16 = vsub.f32 %v14_v0, %v33_v15 }
  0x94   :  { %v35_v17 = vmul.f32 %v34_v16, %v34_v16 }
  0x96   :  { %v36_v18 = vsel %vm15_vm0, %v35_v17, 0.0 }
  0x97   :  { %v37_v19 = vrot.slane %v36_v18, 4 }
  0x99   :  { %v38_v20 = vadd.f32 %v37_v19, %v36_v18 }
  0x9b   :  { %v39_v21 = vrot.slane %v38_v20, 2 }
  0x9d   :  { %v40_v22 = vadd.f32 %v39_v21, %v38_v20 }
  0x9f   :  { %v41_v23 = vrot.slane %v40_v22, 1 }
  0xa1   :  { %v42_v24 = vadd.f32 %v41_v23, %v40_v22 }
  0xa3   :  { %46 = vrot.lane.b32.xlu2 %v42_v24, %s89_s16  ;;  %43 = vrot.lane.b32.xlu1 %v42_v24, %s87_s14 }
  0xab   :  { %49 = vrot.lane.b32.xlu2 %v42_v24, %s88_s15 }
  0xfd   :  { %v47_v25 = vpop.permute.xlu2 %46 }
 0x105   :  { %v50_v29 = vpop.permute.xlu2 %49 }
 0x115   :  { %v44_v26 = vpop.permute.xlu1 %43 }
 0x116   :  { %v45_v27 = vadd.f32 %v44_v26, %v42_v24 }
 0x118   :  { %v48_v28 = vadd.f32 %v47_v25, %v45_v27 }
 0x11a   :  { %v51_v30 = vadd.f32 %v50_v29, %v48_v28 }
 0x11c   :  { %v52_v31 = vmul.f32 0.0625, %v51_v30 }
 0x11e   :  { %v54_v32 = vadd.f32 1e-05, %v52_v31 }
 0x120   :  { %85 = vrsqrt.f32 %v54_v32  ;;  %vm61_vm2 = vweird.f32 %v54_v32 }
 0x126   :  { %v86_v33 = vpop.eup %85 }
 0x127   :  { %v56_v34 = vmul.f32 %v86_v33, %v54_v32  ;;  %vm62_vm1 = vweird.f32 %v86_v33 }
 0x128   :  { %vm63_vm3 = vmor %vm61_vm2, %vm62_vm1 }
 0x129   :  { %v57_v35 = vmul.f32 %v86_v33, %v56_v34 }
 0x12b   :  { %v58_v36 = vmul.f32 0.5, %v57_v35 }
 0x12d   :  { %v59_v37 = vsub.f32 1.5, %v58_v36 }
 0x12f   :  { %v60_v39 = vmul.f32 %v86_v33, %v59_v37 }
 0x131   :  { %v64_v40 = vsel %vm63_vm3, %v86_v33, %v60_v39 }
 0x132   :  { %v65_v41 = vmul.f32 %v64_v40, %v53_v38 }
 0x134   :  { %v67_v43 = vmul.f32 %v65_v41, %v32_v14  ;;  %v70_v44 = vperm.slane %v65_v41, 0 }
 0x136   :  { %v68_v45 = vsub.f32 %v66_v42, %v67_v43  ;;  %v72_v46 = vmul.f32 %v70_v44, %v14_v0 }
 0x138   :  { %v74_v47 = vperm.slane %v68_v45, 0 }
 0x13a   :  { %v76_v48 = vadd.f32 %v74_v47, %v72_v46 }
 0x13c   :  { %77 = vst [vmem:[%s127_s3] sm:$0xf] %v76_v48 }

</bundles_post_ra>
